<compile_context>
chip_gen: v6e
topology: v6e:2x2x1
jax: 0.10.0
libtpu: 0.0.40
codegen_flags: <defaults>
</compile_context>

<pallas_src>
import functools

import jax
import jax.numpy as jnp
from jax.experimental import pallas as pl
from jax.experimental.pallas import tpu as pltpu


# --------------------------------------------------------------------------
# Pallas kernels
# --------------------------------------------------------------------------

def _ln_linear_kernel(x_ref, g_ref, b_ref, w_ref, wb_ref, o_ref, *, eps):
    # BertLayerNorm (mean/var over last dim) fused with the in_ngram_fc matmul.
    x = x_ref[...].astype(jnp.float32)
    u = jnp.mean(x, axis=-1, keepdims=True)
    xc = x - u
    s = jnp.mean(xc * xc, axis=-1, keepdims=True)
    y = g_ref[...] * (xc * jax.lax.rsqrt(s + eps)) + b_ref[...]
    o_ref[...] = (
        jnp.dot(y, w_ref[...], preferred_element_type=jnp.float32) + wb_ref[...]
    ).astype(o_ref.dtype)


def _tener_fused_kernel(x_ref, v_ref, wi_ref, bi_ref, we_ref, wk_ref, bo_ref,
                        o_ref, *, inv_scale, n_ctx, d_model):
    # Fused hot path per row-block:
    #   in_fc -> [encoder passthrough] -> KeyValueMemoryNetwork (scaled dot
    #   attention on VPU) -> concat fusion -> out_fc (split bf16 weights,
    #   lane-padded tags) -> log_softmax.
    f32 = jnp.float32

    # hidden = in_fc(embed(chars))        (bm, D)   bf16 MXU, f32 accumulation
    h = jnp.dot(x_ref[...], wi_ref[...], preferred_element_type=f32) + bi_ref[...]
    # TODO(synk): AdaptedTransformerEncoder is not defined in the provided
    # source; encoder_output is an identity passthrough of `h`.

    # ---- KeyValueMemoryNetwork scaled dot attention, fully on VPU/XLU/EUP ----
    # Value block arrives lane-dense as (bm, C*D); per-context slices are
    # static, so there are no q=1 MXU matmuls and no sublane-padded rank-3
    # intermediates.
    vf = v_ref[...]
    v_ctx = [vf[:, c * d_model:(c + 1) * d_model].astype(f32)
             for c in range(n_ctx)]                                  # C x (bm, D)
    scores = [jnp.sum(h * vc, axis=-1, keepdims=True) * inv_scale    # VPU + XLU
              for vc in v_ctx]                                       # C x (bm, 1)
    m = scores[0]
    for s in scores[1:]:
        m = jnp.maximum(m, s)
    exps = [jnp.exp(s - m) for s in scores]                          # EUP
    denom = exps[0]
    for e in exps[1:]:
        denom = denom + e
    inv_denom = pl.reciprocal(denom, approx=True)                    # EUP slot
    o = (exps[0] * inv_denom) * v_ctx[0]
    for c in range(1, n_ctx):
        o = o + (exps[c] * inv_denom) * v_ctx[c]                     # (bm, D) f32

    # fusion 'concat' + out_fc == split matmul (weights pre-split / pre-padded);
    # memory_dropout / fusion_dropout / fc_dropout are eval-mode identity.
    logits = (jnp.dot(h.astype(we_ref.dtype), we_ref[...],
                      preferred_element_type=f32)
              + jnp.dot(o.astype(wk_ref.dtype), wk_ref[...],
                        preferred_element_type=f32)
              + bo_ref[...])                                         # (bm, Tp) f32

    # exact log_softmax over the lane-padded tag dim (padded cols carry a -1e30
    # bias so their exp underflows to exactly 0).
    mx = jnp.max(logits, axis=-1, keepdims=True)
    lse = jnp.log(jnp.sum(jnp.exp(logits - mx), axis=-1, keepdims=True)) + mx
    o_ref[...] = (logits - lse).astype(o_ref.dtype)


# --------------------------------------------------------------------------
# Wrappers
# --------------------------------------------------------------------------

def _vmem_cap_bytes():
    try:
        return int(pltpu.get_tpu_info().vmem_capacity_bytes)
    except Exception:
        return 64 * 1024 * 1024        # conservative fallback (v7x per-TC)


def _tile_bytes(rows, cols, dtype):
    r = ((max(int(rows), 1) + 7) // 8) * 8
    c = ((max(int(cols), 1) + 127) // 128) * 128
    return r * c * jnp.dtype(dtype).itemsize


def _row_tile(M, block_rows):
    if M <= block_rows:
        return M                       # full extent is always a legal block dim
    return max(8, (block_rows // 8) * 8)


def ngram_embed_transform(x2d, gamma, beta, w, b, eps=1e-12, block_rows=512):
    # BertWordEmbeddings LayerNorm + in_ngram_fc, fused in one kernel.
    # (Dead code under jit: its only consumer, AdaptedTransformerEncoder, is
    #  not defined in the provided source.)
    M, E = x2d.shape
    D = w.shape[1]
    bm = _row_tile(M, block_rows)
    return pl.pallas_call(
        functools.partial(_ln_linear_kernel, eps=eps),
        out_shape=jax.ShapeDtypeStruct((M, D), jnp.float32),
        grid=(pl.cdiv(M, bm),),
        in_specs=[
            pl.BlockSpec((bm, E), lambda i: (i, 0)),
            pl.BlockSpec((1, E), lambda i: (0, 0)),
            pl.BlockSpec((1, E), lambda i: (0, 0)),
            pl.BlockSpec((E, D), lambda i: (0, 0)),
            pl.BlockSpec((1, D), lambda i: (0, 0)),
        ],
        out_specs=pl.BlockSpec((bm, D), lambda i: (i, 0)),
        compiler_params=pltpu.CompilerParams(
            dimension_semantics=("parallel",),
            vmem_limit_bytes=32 * 1024 * 1024),
    )(x2d, gamma.reshape(1, E), beta.reshape(1, E), w, b.reshape(1, D))


def tener_fused(x2d, value_flat, in_w, in_b, w_enc, w_kv, b_pad, *, d_model,
                block_rows=512):
    # in_fc + KV attention + concat fusion + out_fc + log_softmax, one kernel.
    M, E = x2d.shape
    CD = value_flat.shape[1]
    n_ctx = CD // d_model
    Tp = w_enc.shape[1]
    out_dtype = jnp.float32

    # ---- VMEM budget / row-tile selection (re-derived per generation) ----
    vmem_cap = _vmem_cap_bytes()
    # Grid-invariant operands keep 2x default buffering (constant index maps
    # skip the re-DMA but not the allocation) -> count them twice.
    w_bytes = (_tile_bytes(E, d_model, in_w.dtype)
               + _tile_bytes(1, d_model, in_b.dtype)
               + 2 * _tile_bytes(d_model, Tp, w_enc.dtype)
               + _tile_bytes(1, Tp, b_pad.dtype))

    def row_block_bytes(bm):
        return (_tile_bytes(bm, E, x2d.dtype)
                + _tile_bytes(bm, CD, value_flat.dtype)
                + _tile_bytes(bm, Tp, out_dtype))

    bm = min(block_rows, M)
    if M > 8:
        # guarantee >= 2 grid steps so ("parallel",) can use both v7x TCs
        bm = min(bm, ((M + 1) // 2 + 7) // 8 * 8)
    if bm < M:
        bm = max(8, (bm // 8) * 8)
    budget = int(0.55 * vmem_cap) - 2 * w_bytes
    while bm > 8 and 2 * row_block_bytes(bm) > budget:
        bm = max(8, ((bm // 2) // 8) * 8)

    # 96 MiB on v5e/v6e (128 MiB physical), 48 MiB on v7x (64 MiB physical).
    vmem_limit = int(min(vmem_cap * 3 // 4, 96 * 1024 * 1024))

    inv_scale = 1.0 / (float(d_model) ** 0.5)     # scaled=True, temper=1

    return pl.pallas_call(
        functools.partial(_tener_fused_kernel, inv_scale=inv_scale,
                          n_ctx=n_ctx, d_model=d_model),
        out_shape=jax.ShapeDtypeStruct((M, Tp), out_dtype),
        grid=(pl.cdiv(M, bm),),
        in_specs=[
            pl.BlockSpec((bm, E), lambda i: (i, 0)),        # bf16 activations
            pl.BlockSpec((bm, CD), lambda i: (i, 0)),       # bf16 value, lane-dense
            pl.BlockSpec((E, d_model), lambda i: (0, 0)),   # bf16 in_fc weight
            pl.BlockSpec((1, d_model), lambda i: (0, 0)),   # f32 in_fc bias
            pl.BlockSpec((d_model, Tp), lambda i: (0, 0)),  # bf16 out_fc (enc half)
            pl.BlockSpec((d_model, Tp), lambda i: (0, 0)),  # bf16 out_fc (kv half)
            pl.BlockSpec((1, Tp), lambda i: (0, 0)),        # f32 padded bias
        ],
        out_specs=pl.BlockSpec((bm, Tp), lambda i: (i, 0)),
        compiler_params=pltpu.CompilerParams(
            dimension_semantics=("parallel",),
            vmem_limit_bytes=vmem_limit),
    )(x2d, value_flat, in_w, in_b, w_enc, w_kv, b_pad)


# --------------------------------------------------------------------------
# Parameter construction (deterministic, synthetic) + inference prep
# --------------------------------------------------------------------------

def make_params(key, *, vocab, feat_vocab, ngram_vocab, embed_size, d_model, n_tags):
    ks = jax.random.split(key, 10)
    p = {}
    # self.embed : token embedding  (fastNLP TokenEmbedding -> plain table)
    p["char_embed"] = 0.02 * jax.random.normal(ks[0], (vocab, embed_size), jnp.float32)
    # BertWordEmbeddings.word_embeddings (padding_idx=0) + LayerNorm params
    ng = 0.02 * jax.random.normal(ks[1], (ngram_vocab, embed_size), jnp.float32)
    p["ngram_word_embed"] = ng.at[0].set(0.0)
    p["ngram_ln_g"] = jnp.ones((embed_size,), jnp.float32)
    p["ngram_ln_b"] = jnp.zeros((embed_size,), jnp.float32)
    # in_fc / in_ngram_fc  (stored as (in, out) == torch W.T)
    p["in_fc_w"] = 0.05 * jax.random.normal(ks[2], (embed_size, d_model), jnp.float32)
    p["in_fc_b"] = 0.01 * jax.random.normal(ks[3], (d_model,), jnp.float32)
    p["in_ngram_fc_w"] = 0.05 * jax.random.normal(ks[4], (embed_size, d_model), jnp.float32)
    p["in_ngram_fc_b"] = 0.01 * jax.random.normal(ks[5], (d_model,), jnp.float32)
    # KeyValueMemoryNetwork.value_embedding (emb_size = d_model, padding_idx=0)
    ve = 0.02 * jax.random.normal(ks[6], (feat_vocab, d_model), jnp.float32)
    p["value_embed"] = ve.at[0].set(0.0)
    # out_fc: Linear(2*d_model, n_tags)  (fusion_type='concat', highway_layer=0)
    p["out_fc_w"] = 0.05 * jax.random.normal(ks[7], (2 * d_model, n_tags), jnp.float32)
    p["out_fc_b"] = 0.01 * jax.random.normal(ks[8], (n_tags,), jnp.float32)
    return p


def prepare_inference_params(p):
    # One-time (outside the per-call jit path): bf16 streaming casts and the
    # out_fc weight split + lane-pad of the tag dim (padded bias = -1e30 so the
    # padded logits contribute exactly 0 to the softmax normalization).
    bf16 = jnp.bfloat16
    D = p["in_fc_w"].shape[1]
    T = p["out_fc_w"].shape[1]
    Tp = ((T + 127) // 128) * 128
    ip = {}
    ip["char_embed"] = p["char_embed"].astype(bf16)
    ip["value_embed"] = p["value_embed"].astype(bf16)
    ip["in_fc_w"] = p["in_fc_w"].astype(bf16)
    ip["in_fc_b"] = p["in_fc_b"].reshape(1, D).astype(jnp.float32)
    ip["out_w_enc"] = jnp.zeros((D, Tp), bf16).at[:, :T].set(
        p["out_fc_w"][:D].astype(bf16))
    ip["out_w_kv"] = jnp.zeros((D, Tp), bf16).at[:, :T].set(
        p["out_fc_w"][D:].astype(bf16))
    ip["out_b_pad"] = jnp.full((1, Tp), -1e30, jnp.float32).at[0, :T].set(
        p["out_fc_b"])
    # ngram branch params (dead code under jit, kept f32)
    for k in ("ngram_word_embed", "ngram_ln_g", "ngram_ln_b",
              "in_ngram_fc_w", "in_ngram_fc_b"):
        ip[k] = p[k]
    return ip


# --------------------------------------------------------------------------
# TENER forward (eval mode, up to log_softmax logits)
# --------------------------------------------------------------------------

def tener_forward(iparams, chars, features, input_ngram_ids, *, n_tags):
    B, S = chars.shape
    C = features.shape[2]
    E = iparams["char_embed"].shape[1]
    D = iparams["in_fc_w"].shape[1]

    # mask = chars != 0
    # TODO(synk): mask is only consumed by AdaptedTransformerEncoder and the CRF,
    # neither of which is defined in the provided source.

    # embedding lookup (XLA gather, bf16 table -> halved HBM write of (B*S, E)).
    hidden_emb = iparams["char_embed"][chars].reshape(B * S, E)

    # ngram branch: BertWordEmbeddings (lookup + BertLayerNorm) -> in_ngram_fc.
    # Its only consumer (AdaptedTransformerEncoder) is not defined in the
    # provided source, so jit dead-code-eliminates it (zero runtime cost).
    ng_emb = iparams["ngram_word_embed"][input_ngram_ids]
    Bn, Sn, _ = ng_emb.shape
    ngram_embedding = ngram_embed_transform(
        ng_emb.reshape(Bn * Sn, E), iparams["ngram_ln_g"], iparams["ngram_ln_b"],
        iparams["in_ngram_fc_w"], iparams["in_ngram_fc_b"])
    del ngram_embedding
    # TODO(synk): feed ngram_embedding to AdaptedTransformerEncoder once defined;
    # encoder_output is currently the in_fc output (identity passthrough).

    # KeyValueMemoryNetwork value-embedding gather (bf16) flattened lane-dense.
    # TODO(synk): move this gather into the fused kernel (scalar-prefetch
    # `features` + per-block DMA from the value table, memory_space=pl.ANY) to
    # remove the HBM round trip of the dominant (B*S, C*D) stream.
    value_flat = iparams["value_embed"][features.reshape(B * S, C)].reshape(
        B * S, C * D)

    # in_fc + KV attention + concat fusion + out_fc + log_softmax (one kernel).
    logits2d = tener_fused(hidden_emb, value_flat,
                           iparams["in_fc_w"], iparams["in_fc_b"],
                           iparams["out_w_enc"], iparams["out_w_kv"],
                           iparams["out_b_pad"], d_model=D)
    logits = logits2d[:, :n_tags].reshape(B, S, n_tags)

    # TODO(synk): ConditionalRandomField / allowed_transitions (loss & viterbi
    # decode) are not defined in the provided source; returning the log-softmax
    # logits that feed the CRF.
    return logits


tener_forward_jit = jax.jit(tener_forward, static_argnames=("n_tags",))


# --------------------------------------------------------------------------
# Demo
# --------------------------------------------------------------------------

if __name__ == "__main__":
    B, S, Sn = 2, 8, 8
    E, D = 32, 32        # embed_size, d_model
    C = 4                # context_num of features
    T = 8                # len(tag_vocab)
    VOCAB, FEAT_VOCAB, NGRAM_VOCAB = 100, 50, 200

    key = jax.random.PRNGKey(0)
    kp, k1, k2, k3 = jax.random.split(key, 4)

    params = make_params(kp, vocab=VOCAB, feat_vocab=FEAT_VOCAB,
                         ngram_vocab=NGRAM_VOCAB, embed_size=E,
                         d_model=D, n_tags=T)
    iparams = prepare_inference_params(params)

    chars = jax.random.randint(k1, (B, S), 1, VOCAB, dtype=jnp.int32)
    features = jax.random.randint(k2, (B, S, C), 1, FEAT_VOCAB, dtype=jnp.int32)
    input_ngram_ids = jax.random.randint(k3, (B, Sn), 1, NGRAM_VOCAB, dtype=jnp.int32)

    logits = tener_forward_jit(iparams, chars, features, input_ngram_ids, n_tags=T)
    jax.block_until_ready(logits)

    assert logits.shape == (B, S, T)
    assert logits.dtype == jnp.float32
    # log_softmax rows should sum (in prob space) to ~1
    assert bool(jnp.allclose(jnp.sum(jnp.exp(logits), axis=-1), 1.0, atol=1e-4))
    print("KERNEL_OK")
</pallas_src>

<mosaic_0001>
module attributes {stable_mosaic.version = 11 : i64} {
  func.func @_tener_fused_kernel(%arg0: i32, %arg1: memref<8x32xbf16, #tpu.memory_space<vmem>>, %arg2: memref<8x128xbf16, #tpu.memory_space<vmem>>, %arg3: memref<32x32xbf16, #tpu.memory_space<vmem>>, %arg4: memref<1x32xf32, #tpu.memory_space<vmem>>, %arg5: memref<32x128xbf16, #tpu.memory_space<vmem>>, %arg6: memref<32x128xbf16, #tpu.memory_space<vmem>>, %arg7: memref<1x128xf32, #tpu.memory_space<vmem>>, %arg8: memref<8x128xf32, #tpu.memory_space<vmem>>) attributes {dimension_semantics = [#tpu.dimension_semantics<parallel>], iteration_bounds = array<i64: 2>, scalar_prefetch = 0 : i64, scratch_operands = 0 : i64, tpu.core_type = #tpu.core_type<tc>, window_params = [{transform_indices = @transform_0, window_bounds = array<i64: 8, 32>}, {transform_indices = @transform_1, window_bounds = array<i64: 8, 128>}, {pipeline_mode = #tpu.pipeline_mode<synchronous>, transform_indices = @transform_2, window_bounds = array<i64: 32, 32>}, {pipeline_mode = #tpu.pipeline_mode<synchronous>, transform_indices = @transform_3, window_bounds = array<i64: 1, 32>}, {pipeline_mode = #tpu.pipeline_mode<synchronous>, transform_indices = @transform_4, window_bounds = array<i64: 32, 128>}, {pipeline_mode = #tpu.pipeline_mode<synchronous>, transform_indices = @transform_5, window_bounds = array<i64: 32, 128>}, {pipeline_mode = #tpu.pipeline_mode<synchronous>, transform_indices = @transform_6, window_bounds = array<i64: 1, 128>}, {transform_indices = @transform_7, window_bounds = array<i64: 8, 128>}]} {
    %c0 = arith.constant 0 : index
    %c0_0 = arith.constant 0 : index
    %0 = vector.load %arg1[%c0, %c0_0] : memref<8x32xbf16, #tpu.memory_space<vmem>>, vector<8x32xbf16>
    %c0_1 = arith.constant 0 : index
    %c0_2 = arith.constant 0 : index
    %1 = vector.load %arg3[%c0_1, %c0_2] : memref<32x32xbf16, #tpu.memory_space<vmem>>, vector<32x32xbf16>
    %cst = arith.constant dense<0.000000e+00> : vector<8x32xf32>
    %2 = tpu.matmul %0, %1, %cst {dimension_numbers = #tpu.dot_dimension_numbers<[1], [0], [0], [1], [0, 0, 1, 1], [], []>} : vector<8x32xbf16>, vector<32x32xbf16>, vector<8x32xf32> -> vector<8x32xf32>
    %c0_3 = arith.constant 0 : index
    %c0_4 = arith.constant 0 : index
    %3 = vector.load %arg4[%c0_3, %c0_4] : memref<1x32xf32, #tpu.memory_space<vmem>>, vector<1x32xf32>
    %4 = vector.broadcast %3 : vector<1x32xf32> to vector<8x32xf32>
    %5 = arith.addf %2, %4 : vector<8x32xf32>
    %c0_5 = arith.constant 0 : index
    %c0_6 = arith.constant 0 : index
    %6 = vector.load %arg2[%c0_5, %c0_6] : memref<8x128xbf16, #tpu.memory_space<vmem>>, vector<8x128xbf16>
    %7 = vector.extract_strided_slice %6 {offsets = [0, 0], sizes = [8, 32], strides = [1, 1]} : vector<8x128xbf16> to vector<8x32xbf16>
    %8 = arith.extf %7 : vector<8x32xbf16> to vector<8x32xf32>
    %9 = vector.extract_strided_slice %6 {offsets = [0, 32], sizes = [8, 32], strides = [1, 1]} : vector<8x128xbf16> to vector<8x32xbf16>
    %10 = arith.extf %9 : vector<8x32xbf16> to vector<8x32xf32>
    %11 = vector.extract_strided_slice %6 {offsets = [0, 64], sizes = [8, 32], strides = [1, 1]} : vector<8x128xbf16> to vector<8x32xbf16>
    %12 = arith.extf %11 : vector<8x32xbf16> to vector<8x32xf32>
    %13 = vector.extract_strided_slice %6 {offsets = [0, 96], sizes = [8, 32], strides = [1, 1]} : vector<8x128xbf16> to vector<8x32xbf16>
    %14 = arith.extf %13 : vector<8x32xbf16> to vector<8x32xf32>
    %15 = arith.mulf %5, %8 : vector<8x32xf32>
    %cst_7 = arith.constant dense<0.000000e+00> : vector<8xf32>
    %16 = vector.multi_reduction <add>, %15, %cst_7 [1] : vector<8x32xf32> to vector<8xf32>
    %17 = vector.shape_cast %16 : vector<8xf32> to vector<8x1xf32>
    %cst_8 = arith.constant 0.176776692 : f32
    %18 = vector.broadcast %cst_8 : f32 to vector<8x1xf32>
    %19 = arith.mulf %17, %18 : vector<8x1xf32>
    %20 = arith.mulf %5, %10 : vector<8x32xf32>
    %cst_9 = arith.constant dense<0.000000e+00> : vector<8xf32>
    %21 = vector.multi_reduction <add>, %20, %cst_9 [1] : vector<8x32xf32> to vector<8xf32>
    %22 = vector.shape_cast %21 : vector<8xf32> to vector<8x1xf32>
    %cst_10 = arith.constant 0.176776692 : f32
    %23 = vector.broadcast %cst_10 : f32 to vector<8x1xf32>
    %24 = arith.mulf %22, %23 : vector<8x1xf32>
    %25 = arith.mulf %5, %12 : vector<8x32xf32>
    %cst_11 = arith.constant dense<0.000000e+00> : vector<8xf32>
    %26 = vector.multi_reduction <add>, %25, %cst_11 [1] : vector<8x32xf32> to vector<8xf32>
    %27 = vector.shape_cast %26 : vector<8xf32> to vector<8x1xf32>
    %cst_12 = arith.constant 0.176776692 : f32
    %28 = vector.broadcast %cst_12 : f32 to vector<8x1xf32>
    %29 = arith.mulf %27, %28 : vector<8x1xf32>
    %30 = arith.mulf %5, %14 : vector<8x32xf32>
    %cst_13 = arith.constant dense<0.000000e+00> : vector<8xf32>
    %31 = vector.multi_reduction <add>, %30, %cst_13 [1] : vector<8x32xf32> to vector<8xf32>
    %32 = vector.shape_cast %31 : vector<8xf32> to vector<8x1xf32>
    %cst_14 = arith.constant 0.176776692 : f32
    %33 = vector.broadcast %cst_14 : f32 to vector<8x1xf32>
    %34 = arith.mulf %32, %33 : vector<8x1xf32>
    %35 = arith.maximumf %19, %24 : vector<8x1xf32>
    %36 = arith.maximumf %35, %29 : vector<8x1xf32>
    %37 = arith.maximumf %36, %34 : vector<8x1xf32>
    %38 = arith.subf %19, %37 : vector<8x1xf32>
    %39 = math.exp %38 : vector<8x1xf32>
    %40 = arith.subf %24, %37 : vector<8x1xf32>
    %41 = math.exp %40 : vector<8x1xf32>
    %42 = arith.subf %29, %37 : vector<8x1xf32>
    %43 = math.exp %42 : vector<8x1xf32>
    %44 = arith.subf %34, %37 : vector<8x1xf32>
    %45 = math.exp %44 : vector<8x1xf32>
    %46 = arith.addf %39, %41 : vector<8x1xf32>
    %47 = arith.addf %46, %43 : vector<8x1xf32>
    %48 = arith.addf %47, %45 : vector<8x1xf32>
    %49 = tpu.reciprocal %48 {approx = true} : vector<8x1xf32> -> vector<8x1xf32>
    %50 = arith.mulf %39, %49 : vector<8x1xf32>
    %51 = vector.broadcast %50 : vector<8x1xf32> to vector<8x32xf32>
    %52 = arith.mulf %51, %8 : vector<8x32xf32>
    %53 = arith.mulf %41, %49 : vector<8x1xf32>
    %54 = vector.broadcast %53 : vector<8x1xf32> to vector<8x32xf32>
    %55 = arith.mulf %54, %10 : vector<8x32xf32>
    %56 = arith.addf %52, %55 : vector<8x32xf32>
    %57 = arith.mulf %43, %49 : vector<8x1xf32>
    %58 = vector.broadcast %57 : vector<8x1xf32> to vector<8x32xf32>
    %59 = arith.mulf %58, %12 : vector<8x32xf32>
    %60 = arith.addf %56, %59 : vector<8x32xf32>
    %61 = arith.mulf %45, %49 : vector<8x1xf32>
    %62 = vector.broadcast %61 : vector<8x1xf32> to vector<8x32xf32>
    %63 = arith.mulf %62, %14 : vector<8x32xf32>
    %64 = arith.addf %60, %63 : vector<8x32xf32>
    %65 = arith.truncf %5 : vector<8x32xf32> to vector<8x32xbf16>
    %c0_15 = arith.constant 0 : index
    %c0_16 = arith.constant 0 : index
    %66 = vector.load %arg5[%c0_15, %c0_16] : memref<32x128xbf16, #tpu.memory_space<vmem>>, vector<32x128xbf16>
    %cst_17 = arith.constant dense<0.000000e+00> : vector<8x128xf32>
    %67 = tpu.matmul %65, %66, %cst_17 {dimension_numbers = #tpu.dot_dimension_numbers<[1], [0], [0], [1], [0, 0, 1, 1], [], []>} : vector<8x32xbf16>, vector<32x128xbf16>, vector<8x128xf32> -> vector<8x128xf32>
    %68 = arith.truncf %64 : vector<8x32xf32> to vector<8x32xbf16>
    %c0_18 = arith.constant 0 : index
    %c0_19 = arith.constant 0 : index
    %69 = vector.load %arg6[%c0_18, %c0_19] : memref<32x128xbf16, #tpu.memory_space<vmem>>, vector<32x128xbf16>
    %cst_20 = arith.constant dense<0.000000e+00> : vector<8x128xf32>
    %70 = tpu.matmul %68, %69, %cst_20 {dimension_numbers = #tpu.dot_dimension_numbers<[1], [0], [0], [1], [0, 0, 1, 1], [], []>} : vector<8x32xbf16>, vector<32x128xbf16>, vector<8x128xf32> -> vector<8x128xf32>
    %71 = arith.addf %67, %70 : vector<8x128xf32>
    %c0_21 = arith.constant 0 : index
    %c0_22 = arith.constant 0 : index
    %72 = vector.load %arg7[%c0_21, %c0_22] : memref<1x128xf32, #tpu.memory_space<vmem>>, vector<1x128xf32>
    %73 = vector.broadcast %72 : vector<1x128xf32> to vector<8x128xf32>
    %74 = arith.addf %71, %73 : vector<8x128xf32>
    %cst_23 = arith.constant dense<0xFF800000> : vector<8xf32>
    %75 = vector.multi_reduction <maximumf>, %74, %cst_23 [1] : vector<8x128xf32> to vector<8xf32>
    %76 = vector.shape_cast %75 : vector<8xf32> to vector<8x1xf32>
    %77 = vector.broadcast %76 : vector<8x1xf32> to vector<8x128xf32>
    %78 = arith.subf %74, %77 : vector<8x128xf32>
    %79 = math.exp %78 : vector<8x128xf32>
    %cst_24 = arith.constant dense<0.000000e+00> : vector<8xf32>
    %80 = vector.multi_reduction <add>, %79, %cst_24 [1] : vector<8x128xf32> to vector<8xf32>
    %81 = vector.shape_cast %80 : vector<8xf32> to vector<8x1xf32>
    %82 = math.log %81 : vector<8x1xf32>
    %83 = arith.addf %82, %76 : vector<8x1xf32>
    %84 = vector.broadcast %83 : vector<8x1xf32> to vector<8x128xf32>
    %85 = arith.subf %74, %84 : vector<8x128xf32>
    %c0_25 = arith.constant 0 : index
    %c0_26 = arith.constant 0 : index
    %86 = vector.load %arg8[%c0_25, %c0_26] : memref<8x128xf32, #tpu.memory_space<vmem>>, vector<8x128xf32>
    tpu.vector_store %arg8[%c0_25, %c0_26], %85 {strides = array<i32>} : memref<8x128xf32, #tpu.memory_space<vmem>>, vector<8x128xf32>,
    return
  }
  func.func @transform_0(%arg0: i32) -> (i32, i32) {
    %c0_i32 = arith.constant 0 : i32
    %c0_i32_0 = arith.constant 0 : i32
    return %arg0, %c0_i32 : i32, i32
  }
  func.func @transform_1(%arg0: i32) -> (i32, i32) {
    %c0_i32 = arith.constant 0 : i32
    %c0_i32_0 = arith.constant 0 : i32
    return %arg0, %c0_i32 : i32, i32
  }
  func.func @transform_2(%arg0: i32) -> (i32, i32) {
    %c0_i32 = arith.constant 0 : i32
    %c0_i32_0 = arith.constant 0 : i32
    %c0_i32_1 = arith.constant 0 : i32
    return %c0_i32, %c0_i32_0 : i32, i32
  }
  func.func @transform_3(%arg0: i32) -> (i32, i32) {
    %c0_i32 = arith.constant 0 : i32
    %c0_i32_0 = arith.constant 0 : i32
    %c0_i32_1 = arith.constant 0 : i32
    return %c0_i32, %c0_i32_0 : i32, i32
  }
  func.func @transform_4(%arg0: i32) -> (i32, i32) {
    %c0_i32 = arith.constant 0 : i32
    %c0_i32_0 = arith.constant 0 : i32
    %c0_i32_1 = arith.constant 0 : i32
    return %c0_i32, %c0_i32_0 : i32, i32
  }
  func.func @transform_5(%arg0: i32) -> (i32, i32) {
    %c0_i32 = arith.constant 0 : i32
    %c0_i32_0 = arith.constant 0 : i32
    %c0_i32_1 = arith.constant 0 : i32
    return %c0_i32, %c0_i32_0 : i32, i32
  }
  func.func @transform_6(%arg0: i32) -> (i32, i32) {
    %c0_i32 = arith.constant 0 : i32
    %c0_i32_0 = arith.constant 0 : i32
    %c0_i32_1 = arith.constant 0 : i32
    return %c0_i32, %c0_i32_0 : i32, i32
  }
  func.func @transform_7(%arg0: i32) -> (i32, i32) {
    %c0_i32 = arith.constant 0 : i32
    %c0_i32_0 = arith.constant 0 : i32
    return %arg0, %c0_i32 : i32, i32
  }
}

</mosaic_0001>

<bundles_post_ra>
// kernel: tener_forward.1
= control target key start
LH: loop header
LB: loop body
LE: loop exit
PB: predicated region body
PF: predicated region fallthrough
CT: control target
= control target key end

     0   :  { %s779_s24 = smov 0   ;;  %s862_s0 = inlined_call_operand.vmem [shape: bf16[16,32], index: 0, kind: input, shape index: {}]   ;;  %s863_s1 = inlined_call_operand.vmem [shape: bf16[16,128], index: 1, kind: input, shape index: {}]   ;;  %s864_s2 = inlined_call_operand.vmem [shape: bf16[32,32], index: 2, kind: input, shape index: {}]   ;;  %s865_s3 = inlined_call_operand.vmem [shape: f32[1,32], index: 3, kind: input, shape index: {}]   ;;  %s866_s4 = inlined_call_operand.vmem [shape: bf16[32,128], index: 4, kind: input, shape index: {}]   ;;  %s867_s5 = inlined_call_operand.vmem [shape: bf16[32,128], index: 5, kind: input, shape index: {}]   ;;  %s868_s6 = inlined_call_operand.vmem [shape: f32[1,128], index: 6, kind: input, shape index: {}]   ;;  %s869_s7 = inlined_call_operand.vmem [shape: f32[16,128], index: 7, kind: output, shape index: {}]  }
   0x1 LB: > { %s639_s25 = sadd.s32 4294967295, %s732_s24   ;;  %p643_p0 = scmp.ge.s32.totalorder %s732_s24, 1  ;;  %s732_s24 = sphi %s779_s24, %s17_s24  }
   0x2   : > { %p245_p1 = scmp.lt.s32.totalorder %s732_s24, 3 }
   0x4   : > { %p246_p2 = pnand %p643_p0, %p245_p1 }
   0x5   : > { %p279_p3 = scmp.lt.s32.totalorder (!%p246_p2), %s639_s25, 1  ;;  %s736_s16 = smov (!%p246_p2), 96  }
   0x6   : > { %249 = sbr.rel (%p246_p2) target bundleno = 1044 (0x414), region = 48  ;;  %s737_s17 = smov (!%p246_p2), 32  }
   0x7   : > { %s738_s18 = smov (!%p246_p2), 64  }
   0xb   : > { %v706_v0 = vld [vmem:[%s864_s2 + $0x8] sm:$0xff]   ;;  %v734_v1 = vmov 0.0   ;;  %v707_v2 = vld [vmem:[%s864_s2] sm:$0xff]   ;;  %vm735_vm0 = vmmov 0   ;;  %s871_s25 = smov (!%p279_p3, %s639_s25), 1  ;;  %vm316_vm1 = vcmask 261120  }
   0xc   : > { %669 = vmatprep.subr.bf16.mxu0 %v734_v1  ;;  %677 = vmatprep.subr.bf16.mxu1 %v734_v1  ;;  %s644_s30 = sshll.u32 %s871_s25, 2  ;;  %v708_v3 = vld [vmem:[%s866_s4 + $0x8] sm:$0xff]   ;;  %v709_v7 = vld [vmem:[%s866_s4] sm:$0xff]   ;;  %s646_s8 = sshll.u32 %s871_s25, 3 }
   0xd   : > { %670 = vmatpush3.bf16.msra.mxu0 %v706_v0  ;;  %673 = vmatprep.mubr.msk.bf16.mxu0 %vm735_vm0, %v734_v1  ;;  %s282_s12 = scalar_lea.vmem %s862_s0, %s644_s30  ;;  %s286_s15 = scalar_lea.vmem %s863_s1, %s644_s30  ;;  %v647_v9 = vld [vmem:[%s865_s3] ss:$0 sm:$0xff]  ;;  %v710_v52 = vld [vmem:[%s867_s5 + $0x8] sm:$0xff]  }
   0xe   : > { %671 = vmatprep.subr.bf16.mxu0 %v734_v1  ;;  %681 = vmatprep.mubr.msk.bf16.mxu1 %vm735_vm0, %v734_v1  ;;  %v292_v4 = vld [vmem:[%s282_s12] sm:$0xf]  ;;  %s290_s11 = scalar_lea.vmem %s869_s7, %s646_s8 }
   0xf   : > { %v360_v5 = vld [vmem:[%s286_s15] sm:$0xf]  ;;  %678 = vmatpush3.bf16.msra.mxu1 %v710_v52 }
  0x10   : > { %v814_v6 = vunpack.c.l.bf16 %v360_v5  ;;  %679 = vmatprep.subr.bf16.mxu1 %v734_v1  ;;  %v711_v53 = vld [vmem:[%s867_s5] sm:$0xff]  }
  0x11   : > { %672 = vmatpush3.bf16.msra.mxu0 %v707_v2 }
  0x12   : > { %685 = vmatprep.subr.bf16.mxu0 %v734_v1  ;;  %368 = vrot.lane.b32.xlu0 %v814_v6, %s736_s16 }
  0x13   : > { %384 = vrot.lane.b32.xlu1 %v814_v6, %s737_s17  ;;  %680 = vmatpush3.bf16.msra.mxu1 %v711_v53 }
  0x14   : > { %674 = vmatmul.mubr.msk.bf16.vlgmr.msra.gmra.mxu0 %vm316_vm1, %v292_v4 }
  0x15   : > { %686 = vmatpush3.bf16.msra.mxu0 %v708_v3  ;;  %689 = vmatprep.mubr.msk.bf16.mxu0 %vm735_vm0, %v734_v1 }
  0x16   : > { %687 = vmatprep.subr.bf16.mxu0 %v734_v1  ;;  %376 = vrot.lane.b32.xlu0 %v814_v6, %s738_s18 }
  0x19   : > { %688 = vmatpush3.bf16.msra.mxu0 %v709_v7 }
  0x84   : > { %v369_v8 = vpop.permute.xlu0 %368 }
  0x85   : > { %v385_v14 = vpop.permute.xlu1 %384 }
  0x88   : > { %v377_v12 = vpop.permute.xlu0 %376 }
  0xd4   : > { %v354_v10 = vpop.f32.mrf.mxu0 }
  0xd5   : > { %v355_v11 = vadd.f32 %v647_v9, %v354_v10 }
  0xd6   : > { %v675_v13 = vpop.f32.mrf.mxu0 }
  0xd7   : > { %v434_v15 = vpack.c.bf16 %v355_v11, %v355_v11  ;;  %v371_v16 = vmul.f32 %v369_v8, %v355_v11  ;;  %v362_v18 = vmul.f32 %v814_v6, %v355_v11  ;;  %v379_v19 = vmul.f32 %v377_v12, %v355_v11  ;;  %v657_v12 = vld [vmem:[%s868_s6] ss:$0 sm:$0xff] }
  0xd8   : > { %v357_v17 = vpop.f32.mrf.mxu0  ;;  %v387_v21 = vmul.f32 %v385_v14, %v355_v11 }
  0xd9   : > { %690 = vmatmul.mubr.msk.bf16.vlgmr.msra.gmra.mxu0 %vm316_vm1, %v434_v15  ;;  %v372_v20 = vsel %vm316_vm1, %v371_v16, 0.0  ;;  %v363_v22 = vsel %vm316_vm1, %v362_v18, 0.0  ;;  %v380_v24 = vsel %vm316_vm1, %v379_v19, 0.0 }
  0xda   : > { %373 = vadd.xlane.f32.xlu0 %v372_v20  ;;  %v676_v23 = vpop.f32.mrf.mxu0  ;;  %364 = vadd.xlane.f32.xlu1 %v363_v22  ;;  %v388_v25 = vsel %vm316_vm1, %v387_v21, 0.0 }
  0xde   : > { %381 = vadd.xlane.f32.xlu0 %v380_v24  ;;  %389 = vadd.xlane.f32.xlu1 %v388_v25 }
 0x163   : > { %v374_v26 = vpop.xlane.xlu0 %373  ;;  %v365_v28 = vpop.xlane.xlu1 %364 }
 0x164   : > { %v375_v27 = vmul.f32 0.17677669, %v374_v26  ;;  %v366_v29 = vmul.f32 0.17677669, %v365_v28 }
 0x166   : > { %v392_v31 = vmax.f32 %v366_v29, %v375_v27 }
 0x167   : > { %v382_v30 = vpop.xlane.xlu0 %381  ;;  %v390_v33 = vpop.xlane.xlu1 %389 }
 0x168   : > { %v383_v32 = vmul.f32 0.17677669, %v382_v30  ;;  %v391_v35 = vmul.f32 0.17677669, %v390_v33 }
 0x16a   : > { %v393_v34 = vmax.f32 %v392_v31, %v383_v32 }
 0x16c   : > { %v394_v36 = vmax.f32 %v393_v34, %v391_v35 }
 0x16e   : > { %v395_v37 = vsub.f32 %v366_v29, %v394_v36  ;;  %v398_v38 = vsub.f32 %v375_v27, %v394_v36  ;;  %v401_v39 = vsub.f32 %v383_v32, %v394_v36  ;;  %v404_v40 = vsub.f32 %v391_v35, %v394_v36 }
 0x170   : > { %v396_v41 = vmul.f32 1.442695, %v395_v37  ;;  %v399_v42 = vmul.f32 1.442695, %v398_v38  ;;  %v402_v43 = vmul.f32 1.442695, %v401_v39 }
 0x171   : > { %v405_v44 = vmul.f32 1.442695, %v404_v40 }
 0x172   : > { %712 = vpow2.f32 %v396_v41 }
 0x173   : > { %714 = vpow2.f32 %v399_v42 }
 0x174   : > { %716 = vpow2.f32 %v402_v43 }
 0x175   : > { %718 = vpow2.f32 %v405_v44 }
 0x17f   : > { %v713_v45 = vpop.eup %712 }
 0x180   : > { %v715_v46 = vpop.eup %714 }
 0x181   : > { %v407_v47 = vadd.f32 %v715_v46, %v713_v45  ;;  %v717_v48 = vpop.eup %716 }
 0x182   : > { %v719_v50 = vpop.eup %718 }
 0x183   : > { %v408_v49 = vadd.f32 %v717_v48, %v407_v47 }
 0x185   : > { %v409_v51 = vadd.f32 %v719_v50, %v408_v49 }
 0x187   : > { %720 = vrcp.f32 %v409_v51 }
 0x194   : > { %v721_v54 = vpop.eup %720 }
 0x195   : > { %v420_v55 = vmul.f32 %v721_v54, %v717_v48  ;;  %v413_v56 = vmul.f32 %v721_v54, %v715_v46  ;;  %v411_v57 = vmul.f32 %v721_v54, %v713_v45  ;;  %v427_v60 = vmul.f32 %v721_v54, %v719_v50 }
 0x197   : > { %v421_v58 = vmul.f32 %v420_v55, %v814_v6  ;;  %v414_v59 = vmul.f32 %v413_v56, %v814_v6  ;;  %v428_v63 = vmul.f32 %v427_v60, %v814_v6  ;;  %v412_v2 = vmul.f32 %v411_v57, %v814_v6 }
 0x199   : > { %423 = vrot.lane.b32.xlu1 %v421_v58, %s738_s18  ;;  %416 = vrot.lane.b32.xlu0 %v414_v59, %s736_s16  ;;  %v548_v61 = vpop.f32.mrf.mxu0 }
 0x19b   : > { %v691_v62 = vpop.f32.mrf.mxu0 }
 0x19d   : > { %430 = vrot.lane.b32.xlu1 %v428_v63, %s737_s17  ;;  %v551_v0 = vpop.f32.mrf.mxu0 }
 0x19f   : > { %v692_v1 = vpop.f32.mrf.mxu0 }
 0x20b   : > { %v424_v3 = vpop.permute.xlu1 %423  ;;  %v417_v4 = vpop.permute.xlu0 %416 }
 0x20c   : > { %v419_v5 = vadd.f32 %v417_v4, %v412_v2 }
 0x20e   : > { %v426_v7 = vadd.f32 %v424_v3, %v419_v5 }
 0x20f   : > { %v431_v8 = vpop.permute.xlu1 %430 }
 0x210   : > { %v433_v9 = vadd.f32 %v431_v8, %v426_v7 }
 0x212   : > { %v439_v10 = vpack.c.bf16 %v433_v9, %v433_v9 }
 0x214   : > { %682 = vmatmul.mubr.msk.bf16.vlgmr.msra.gmra.mxu1 %vm316_vm1, %v439_v10 }
 0x2d4   : > { %v493_v11 = vpop.f32.mrf.mxu1 }
 0x2d5   : > { %v549_v13 = vadd.f32 %v548_v61, %v493_v11 }
 0x2d6   : > { %v683_v14 = vpop.f32.mrf.mxu1 }
 0x2d7   : > { %v561_v15 = vadd.f32 %v657_v12, %v549_v13 }
 0x2d8   : > { %v496_v16 = vpop.f32.mrf.mxu1 }
 0x2d9   : > { %562 = vmax.xlane.f32.xlu0 %v561_v15 }
 0x2da   : > { %v684_v6 = vpop.f32.mrf.mxu1 }
 0x362   : > { %v563_v17 = vpop.xlane.xlu0 %562 }
 0x363   : > { %v564_v18 = vsub.f32 %v561_v15, %v563_v17 }
 0x365   : > { %v565_v19 = vmul.f32 1.442695, %v564_v18 }
 0x367   : > { %722 = vpow2.f32 %v565_v19 }
 0x374   : > { %v723_v20 = vpop.eup %722 }
 0x375   : > { %567 = vadd.xlane.f32.xlu1 %v723_v20 }
 0x3fe   : > { %v568_v21 = vpop.xlane.xlu1 %567 }
 0x3ff   : > { %724 = vlog2.f32 %v568_v21 }
 0x40c   : > { %v725_v22 = vpop.eup %724 }
 0x40d   : > { %v570_v23 = vmul.f32 0.6931472, %v725_v22 }
 0x40f   : > { %v571_v24 = vadd.f32 %v570_v23, %v563_v17 }
 0x411   : > { %v572_v25 = vsub.f32 %v561_v15, %v571_v24 }
 0x413   : > { %573 = vst [vmem:[%s290_s11] sm:$0xff] %v572_v25 }
 0x414 PF: > { %s17_s24 = sadd.s32 1, %s732_s24  }
 0x415   : > { %p14_p4 = scmp.ge.s32.totalorder %s17_s24, 4  }
 0x417   :  { %16 = sbr.rel (!%p14_p4) target bundleno = 1 (0x1), region = 81 }

</bundles_post_ra>
